<compile_context>
chip_gen: v5e
topology: v5e:2x2
jax: 0.10.0
libtpu: 0.0.40
codegen_flags: <defaults>
</compile_context>

<pallas_src>
import jax
import jax.numpy as jnp
from jax.experimental import pallas as pl
from jax.experimental.pallas import tpu as pltpu


def dmlp_kernel(x_ref, w1_ref, b1_ref, w2_ref, b2_ref, w3_ref, b3_ref, o_ref):
    # Layer 1: linear + relu  (dropout d1 is identity in eval mode)
    h1 = jnp.dot(x_ref[...], w1_ref[...], preferred_element_type=jnp.float32)
    h1 = jnp.maximum(h1 + b1_ref[...], 0.0)
    # Layer 2: linear + relu  (dropout d2 is identity in eval mode)
    h2 = jnp.dot(h1.astype(w2_ref.dtype), w2_ref[...],
                 preferred_element_type=jnp.float32)
    h2 = jnp.maximum(h2 + b2_ref[...], 0.0)
    # Layer 3: linear (no activation); output slab is lane-dense (padded odim)
    out = jnp.dot(h2.astype(w3_ref.dtype), w3_ref[...],
                  preferred_element_type=jnp.float32) + b3_ref[...]
    o_ref[...] = out.astype(o_ref.dtype)


def _round_up(a, m):
    return (a + m - 1) // m * m


def dmlp_forward(x, params, *, tb=None, compute_dtype=jnp.bfloat16):
    """x: (B, ind). params: dict of (in, out) weights and (1, out) biases."""
    w1, b1, w2, b2, w3, b3 = (params["w1"], params["b1"], params["w2"],
                              params["b2"], params["w3"], params["b3"])
    B, ind = x.shape
    hdim1 = w1.shape[1]
    hdim2 = w2.shape[1]
    odim = w3.shape[1]
    out_dtype = x.dtype

    # --- Lane-dense output: pad odim up to a multiple of 128 with zeros. ---
    opad = max(_round_up(odim, 128), 128)
    w3p = jnp.zeros((hdim2, opad), w3.dtype).at[:, :odim].set(w3)
    b3p = jnp.zeros((1, opad), b3.dtype).at[:, :odim].set(b3)

    # --- bf16 activations/weights, f32 biases (f32 MXU accumulation). ---
    xc = x.astype(compute_dtype)
    w1c = w1.astype(compute_dtype)
    w2c = w2.astype(compute_dtype)
    w3c = w3p.astype(compute_dtype)
    b1c = b1.astype(jnp.float32)
    b2c = b2.astype(jnp.float32)
    b3c = b3p.astype(jnp.float32)

    # --- Batch tile: big (amortize grid-step overhead, fill MXU rows), ---
    # --- multiple of 8 sublanes, >=2 grid steps at large B for v7x megacore. ---
    if tb is None:
        tb = 1024 if B > 1024 else _round_up(B, 8)
    tb = _round_up(min(tb, _round_up(B, 8)), 8)
    Bp = _round_up(B, tb)
    if Bp != B:
        xc = jnp.pad(xc, ((0, Bp - B), (0, 0)))
    grid = (Bp // tb,)

    full = lambda shape: pl.BlockSpec(shape, lambda i: (0, 0))

    itemsize = lambda a: a.size * jnp.dtype(a.dtype).itemsize
    flops = 2 * Bp * (ind * hdim1 + hdim1 * hdim2 + hdim2 * opad)
    bytes_accessed = (itemsize(xc)
                      + Bp * opad * jnp.dtype(out_dtype).itemsize
                      + sum(itemsize(a) for a in (w1c, b1c, w2c, b2c, w3c, b3c)))

    out_padded = pl.pallas_call(
        dmlp_kernel,
        out_shape=jax.ShapeDtypeStruct((Bp, opad), out_dtype),
        grid_spec=pltpu.PrefetchScalarGridSpec(
            num_scalar_prefetch=0,
            grid=grid,
            in_specs=[
                pl.BlockSpec((tb, ind), lambda i: (i, 0)),   # x tile over batch
                full((ind, hdim1)),    # w1 (VMEM-resident, full)
                full((1, hdim1)),      # b1
                full((hdim1, hdim2)),  # w2
                full((1, hdim2)),      # b2
                full((hdim2, opad)),   # w3 (lane-padded)
                full((1, opad)),       # b3 (lane-padded)
            ],
            out_specs=pl.BlockSpec((tb, opad), lambda i: (i, 0)),
        ),
        compiler_params=pltpu.CompilerParams(
            dimension_semantics=("parallel",)),
        cost_estimate=pl.CostEstimate(flops=flops, transcendentals=0,
                                      bytes_accessed=bytes_accessed),
    )(xc, w1c, b1c, w2c, b2c, w3c, b3c)

    return out_padded[:B, :odim]


def init_dmlp_params(key, ind, hdim1, hdim2, odim, dtype=jnp.float32):
    """Deterministic init mimicking nn.Linear: U(-1/sqrt(fan_in), 1/sqrt(fan_in)).
    Weights stored transposed as (in, out)."""
    ks = jax.random.split(key, 6)

    def lin(kw, kb, fan_in, fan_out):
        bound = 1.0 / jnp.sqrt(fan_in)
        w = jax.random.uniform(kw, (fan_in, fan_out), dtype, -bound, bound)
        b = jax.random.uniform(kb, (1, fan_out), dtype, -bound, bound)
        return w, b

    w1, b1 = lin(ks[0], ks[1], ind, hdim1)
    w2, b2 = lin(ks[2], ks[3], hdim1, hdim2)
    w3, b3 = lin(ks[4], ks[5], hdim2, odim)
    return {"w1": w1, "b1": b1, "w2": w2, "b2": b2, "w3": w3, "b3": b3}


def dmlp_ref_f32(x, p):
    """Exact eval-mode forward in f32 (semantics reference)."""
    hp = jax.lax.Precision.HIGHEST
    h1 = jnp.maximum(jnp.dot(x, p["w1"], precision=hp) + p["b1"], 0.0)
    h2 = jnp.maximum(jnp.dot(h1, p["w2"], precision=hp) + p["b2"], 0.0)
    return jnp.dot(h2, p["w3"], precision=hp) + p["b3"]


def dmlp_ref_mixed(x, p):
    """Reference that mirrors the kernel's bf16-in / f32-accumulate precision."""
    bf, f32 = jnp.bfloat16, jnp.float32
    xb = x.astype(bf)
    w1, w2, w3 = p["w1"].astype(bf), p["w2"].astype(bf), p["w3"].astype(bf)
    b1, b2, b3 = p["b1"].astype(f32), p["b2"].astype(f32), p["b3"].astype(f32)
    h1 = jnp.maximum(jnp.dot(xb, w1, preferred_element_type=f32) + b1, 0.0)
    h2 = jnp.maximum(jnp.dot(h1.astype(bf), w2, preferred_element_type=f32) + b2, 0.0)
    return jnp.dot(h2.astype(bf), w3, preferred_element_type=f32) + b3


if __name__ == "__main__":
    # DMLP(ind=32, hdim1=64, hdim2=48, odim=16, DP=0.1) -- DP irrelevant in eval mode
    ind, hdim1, hdim2, odim = 32, 64, 48, 16
    B = 256            # batch; tile tb=128 -> 2 parallel grid steps

    key = jax.random.PRNGKey(0)
    kx, kp = jax.random.split(key)
    x = jax.random.normal(kx, (B, ind), jnp.float32)
    params = init_dmlp_params(kp, ind, hdim1, hdim2, odim)

    out = dmlp_forward(x, params, tb=128)
    out = jax.block_until_ready(out)
    assert out.shape == (B, odim)

    # Tight check against a reference that mirrors the kernel's precision.
    ref_mixed = dmlp_ref_mixed(x, params)
    assert jnp.allclose(out, ref_mixed, atol=2e-3, rtol=2e-3), \
        "mismatch vs bf16-precision reference"

    # Loose check against the exact f32 eval-mode forward (PyTorch semantics).
    ref_f32 = dmlp_ref_f32(x, params)
    assert jnp.allclose(out, ref_f32, atol=5e-2, rtol=5e-2), \
        "mismatch vs f32 semantics reference"

    print("KERNEL_OK")
</pallas_src>

<mosaic_0001>
module attributes {stable_mosaic.version = 11 : i64} {
  func.func @dmlp_kernel(%arg0: i32, %arg1: memref<128x32xbf16, #tpu.memory_space<vmem>>, %arg2: memref<32x64xbf16, #tpu.memory_space<vmem>>, %arg3: memref<1x64xf32, #tpu.memory_space<vmem>>, %arg4: memref<64x48xbf16, #tpu.memory_space<vmem>>, %arg5: memref<1x48xf32, #tpu.memory_space<vmem>>, %arg6: memref<48x128xbf16, #tpu.memory_space<vmem>>, %arg7: memref<1x128xf32, #tpu.memory_space<vmem>>, %arg8: memref<128x128xf32, #tpu.memory_space<vmem>>) attributes {dimension_semantics = [#tpu.dimension_semantics<parallel>], iteration_bounds = array<i64: 2>, scalar_prefetch = 0 : i64, scratch_operands = 0 : i64, tpu.core_type = #tpu.core_type<tc>, window_params = [{transform_indices = @transform_0, window_bounds = array<i64: 128, 32>}, {pipeline_mode = #tpu.pipeline_mode<synchronous>, transform_indices = @transform_1, window_bounds = array<i64: 32, 64>}, {pipeline_mode = #tpu.pipeline_mode<synchronous>, transform_indices = @transform_2, window_bounds = array<i64: 1, 64>}, {pipeline_mode = #tpu.pipeline_mode<synchronous>, transform_indices = @transform_3, window_bounds = array<i64: 64, 48>}, {pipeline_mode = #tpu.pipeline_mode<synchronous>, transform_indices = @transform_4, window_bounds = array<i64: 1, 48>}, {pipeline_mode = #tpu.pipeline_mode<synchronous>, transform_indices = @transform_5, window_bounds = array<i64: 48, 128>}, {pipeline_mode = #tpu.pipeline_mode<synchronous>, transform_indices = @transform_6, window_bounds = array<i64: 1, 128>}, {transform_indices = @transform_7, window_bounds = array<i64: 128, 128>}]} {
    %c0 = arith.constant 0 : index
    %c0_0 = arith.constant 0 : index
    %0 = vector.load %arg1[%c0, %c0_0] : memref<128x32xbf16, #tpu.memory_space<vmem>>, vector<128x32xbf16>
    %c0_1 = arith.constant 0 : index
    %c0_2 = arith.constant 0 : index
    %1 = vector.load %arg2[%c0_1, %c0_2] : memref<32x64xbf16, #tpu.memory_space<vmem>>, vector<32x64xbf16>
    %cst = arith.constant dense<0.000000e+00> : vector<128x64xf32>
    %2 = tpu.matmul %0, %1, %cst {dimension_numbers = #tpu.dot_dimension_numbers<[1], [0], [0], [1], [0, 0, 1, 1], [], []>} : vector<128x32xbf16>, vector<32x64xbf16>, vector<128x64xf32> -> vector<128x64xf32>
    %c0_3 = arith.constant 0 : index
    %c0_4 = arith.constant 0 : index
    %3 = vector.load %arg3[%c0_3, %c0_4] : memref<1x64xf32, #tpu.memory_space<vmem>>, vector<1x64xf32>
    %4 = vector.broadcast %3 : vector<1x64xf32> to vector<128x64xf32>
    %5 = arith.addf %2, %4 : vector<128x64xf32>
    %cst_5 = arith.constant 0.000000e+00 : f32
    %6 = vector.broadcast %cst_5 : f32 to vector<128x64xf32>
    %7 = arith.maximumf %5, %6 : vector<128x64xf32>
    %8 = arith.truncf %7 : vector<128x64xf32> to vector<128x64xbf16>
    %c0_6 = arith.constant 0 : index
    %c0_7 = arith.constant 0 : index
    %9 = vector.load %arg4[%c0_6, %c0_7] : memref<64x48xbf16, #tpu.memory_space<vmem>>, vector<64x48xbf16>
    %cst_8 = arith.constant dense<0.000000e+00> : vector<128x48xf32>
    %10 = tpu.matmul %8, %9, %cst_8 {dimension_numbers = #tpu.dot_dimension_numbers<[1], [0], [0], [1], [0, 0, 1, 1], [], []>} : vector<128x64xbf16>, vector<64x48xbf16>, vector<128x48xf32> -> vector<128x48xf32>
    %c0_9 = arith.constant 0 : index
    %c0_10 = arith.constant 0 : index
    %11 = vector.load %arg5[%c0_9, %c0_10] : memref<1x48xf32, #tpu.memory_space<vmem>>, vector<1x48xf32>
    %12 = vector.broadcast %11 : vector<1x48xf32> to vector<128x48xf32>
    %13 = arith.addf %10, %12 : vector<128x48xf32>
    %cst_11 = arith.constant 0.000000e+00 : f32
    %14 = vector.broadcast %cst_11 : f32 to vector<128x48xf32>
    %15 = arith.maximumf %13, %14 : vector<128x48xf32>
    %16 = arith.truncf %15 : vector<128x48xf32> to vector<128x48xbf16>
    %c0_12 = arith.constant 0 : index
    %c0_13 = arith.constant 0 : index
    %17 = vector.load %arg6[%c0_12, %c0_13] : memref<48x128xbf16, #tpu.memory_space<vmem>>, vector<48x128xbf16>
    %cst_14 = arith.constant dense<0.000000e+00> : vector<128x128xf32>
    %18 = tpu.matmul %16, %17, %cst_14 {dimension_numbers = #tpu.dot_dimension_numbers<[1], [0], [0], [1], [0, 0, 1, 1], [], []>} : vector<128x48xbf16>, vector<48x128xbf16>, vector<128x128xf32> -> vector<128x128xf32>
    %c0_15 = arith.constant 0 : index
    %c0_16 = arith.constant 0 : index
    %19 = vector.load %arg7[%c0_15, %c0_16] : memref<1x128xf32, #tpu.memory_space<vmem>>, vector<1x128xf32>
    %20 = vector.broadcast %19 : vector<1x128xf32> to vector<128x128xf32>
    %21 = arith.addf %18, %20 : vector<128x128xf32>
    %c0_17 = arith.constant 0 : index
    %c0_18 = arith.constant 0 : index
    %22 = vector.load %arg8[%c0_17, %c0_18] : memref<128x128xf32, #tpu.memory_space<vmem>>, vector<128x128xf32>
    tpu.vector_store %arg8[%c0_17, %c0_18], %21 {strides = array<i32>} : memref<128x128xf32, #tpu.memory_space<vmem>>, vector<128x128xf32>,
    return
  }
  func.func @transform_0(%arg0: i32) -> (i32, i32) {
    %c0_i32 = arith.constant 0 : i32
    %c0_i32_0 = arith.constant 0 : i32
    return %arg0, %c0_i32 : i32, i32
  }
  func.func @transform_1(%arg0: i32) -> (i32, i32) {
    %c0_i32 = arith.constant 0 : i32
    %c0_i32_0 = arith.constant 0 : i32
    %c0_i32_1 = arith.constant 0 : i32
    return %c0_i32, %c0_i32_0 : i32, i32
  }
  func.func @transform_2(%arg0: i32) -> (i32, i32) {
    %c0_i32 = arith.constant 0 : i32
    %c0_i32_0 = arith.constant 0 : i32
    %c0_i32_1 = arith.constant 0 : i32
    return %c0_i32, %c0_i32_0 : i32, i32
  }
  func.func @transform_3(%arg0: i32) -> (i32, i32) {
    %c0_i32 = arith.constant 0 : i32
    %c0_i32_0 = arith.constant 0 : i32
    %c0_i32_1 = arith.constant 0 : i32
    return %c0_i32, %c0_i32_0 : i32, i32
  }
  func.func @transform_4(%arg0: i32) -> (i32, i32) {
    %c0_i32 = arith.constant 0 : i32
    %c0_i32_0 = arith.constant 0 : i32
    %c0_i32_1 = arith.constant 0 : i32
    return %c0_i32, %c0_i32_0 : i32, i32
  }
  func.func @transform_5(%arg0: i32) -> (i32, i32) {
    %c0_i32 = arith.constant 0 : i32
    %c0_i32_0 = arith.constant 0 : i32
    %c0_i32_1 = arith.constant 0 : i32
    return %c0_i32, %c0_i32_0 : i32, i32
  }
  func.func @transform_6(%arg0: i32) -> (i32, i32) {
    %c0_i32 = arith.constant 0 : i32
    %c0_i32_0 = arith.constant 0 : i32
    %c0_i32_1 = arith.constant 0 : i32
    return %c0_i32, %c0_i32_0 : i32, i32
  }
  func.func @transform_7(%arg0: i32) -> (i32, i32) {
    %c0_i32 = arith.constant 0 : i32
    %c0_i32_0 = arith.constant 0 : i32
    return %arg0, %c0_i32 : i32, i32
  }
}

</mosaic_0001>

<bundles_post_ra>
// kernel: tpu_custom_call.1
= control target key start
LH: loop header
LB: loop body
LE: loop exit
PB: predicated region body
PF: predicated region fallthrough
CT: control target
= control target key end

     0   :  { %12 = vsyncpa [#allocation3], 0  ;;  %s1251_s0 = inlined_call_operand.vmem [shape: bf16[256,32], index: 0, kind: input, shape index: {}]   ;;  %s1252_s1 = inlined_call_operand.vmem [shape: bf16[32,64], index: 1, kind: input, shape index: {}]   ;;  %s1253_s2 = inlined_call_operand.vmem [shape: f32[1,64], index: 2, kind: input, shape index: {}]   ;;  %s1254_s3 = inlined_call_operand.vmem [shape: bf16[64,48], index: 3, kind: input, shape index: {}]   ;;  %s1255_s4 = inlined_call_operand.vmem [shape: f32[1,48], index: 4, kind: input, shape index: {}]   ;;  %s1256_s5 = inlined_call_operand.vmem [shape: bf16[48,128], index: 5, kind: input, shape index: {}]   ;;  %s1257_s6 = inlined_call_operand.vmem [shape: f32[1,128], index: 6, kind: input, shape index: {}]   ;;  %s1258_s7 = inlined_call_operand.hbm [shape: f32[256,128], index: 7, kind: output, shape index: {}]  }
   0x1   :  { %14 = vsyncpa [#allocation3 + $0x1], 0  ;;  %s1066_s24 = smov 0   ;;  %s1068_s25 = smov 0  }
   0x2   :  { %s1070_s26 = smov 0   ;;  %s1072_s27 = smov 0  }
   0x3 LB: > { %s1087_s28 = sadd.s32 4294967295, %s1022_s27   ;;  %s785_s29 = sadd.s32 4294967294, %s1022_s27   ;;  %s1022_s27 = sphi %s1072_s27, %s1264_s27   ;;  %s1018_s26 = sphi %s1070_s26, %s1263_s26   ;;  %s1014_s25 = sphi %s1068_s25, %s1262_s25   ;;  %s1010_s24 = sphi %s1066_s24, %s1261_s24  }
   0x4   : > { %s1091_s30 = sadd.s32 1, %s1022_s27   ;;  %s179_s8 = sadd.s32 1, %s1018_s26 }
   0x5   : > { %s176_s9 = ssub.s32 %s1022_s27, %s1091_s30  ;;  %p189_p0 = scmp.ne.s32.totalorder %s1018_s26, %s1014_s25 }
   0x6   : > { %p177_p1 = scmp.eq.s32.totalorder %s176_s9, 0  ;;  %p190_p2 = scmp.eq.s32.totalorder %s1087_s28, 1 }
   0x7   : > { %p195_p3 = scmp.ne.s32.totalorder %s1014_s25, %s1010_s24  ;;  %p196_p4 = scmp.eq.s32.totalorder %s785_s29, 1 }
   0x8   : > { %s1102_s10 = scalar_select %p177_p1, %s1018_s26, %s179_s8  }
   0x9   : > { %p1104_p5 = por %p190_p2, %p189_p0  ;;  %p1108_p6 = por %p196_p4, %p195_p3 }
   0xa   : > { %p788_p7 = scmp.ge.s32.totalorder %s1022_s27, 1  ;;  %p241_p8 = scmp.lt.s32.totalorder %s1022_s27, 3 }
   0xc   : > { %p242_p9 = pnand %p788_p7, %p241_p8 }
   0xd   : > { %s790_s15 = sshll.u32 (!%p242_p9), %s1087_s28, 4  ;;  %s270_s9 = sand.u32 (!%p242_p9), 1, %s1014_s25  }
   0xe   : > { %245 = sbr.rel (%p242_p9) target bundleno = 571 (0x23b), region = 48  ;;  %p274_p10 = scmp.lt.s32.totalorder (!%p242_p9), %s790_s15, 31 }
   0xf   : > { %s789_s13 = sshll.u32 (!%p242_p9), %s270_s9, 7  ;;  %s906_s17 = sshll.u32 (!%p242_p9), %s1087_s28, 7 }
  0x10   : > { %s1199_s16 = scalar_lea.vmem (!%p242_p9), [#allocation2], %s789_s13  ;;  %s719_s20 = scalar_lea.hbm (!%p242_p9), %s1258_s7, %s906_s17 }
  0x11   : > { %s722_s22 = sshll.u32 (!%p242_p9), %s719_s20, 4  ;;  %s708_s23 = scalar_lea.sflag (!%p242_p9), [#allocation3], %s270_s9  ;;  %s723_s22 = int_to_ptr.hbm [resolvable:$true] %s722_s22 }
  0x12   : > { %s974_s29 = sshra.s32 (!%p242_p9), %s723_s22, 4  ;;  %s980_s14 = scalar_lea.hbm (!%p242_p9), %s1258_s7, 256  ;;  %s975_s29 = int_to_ptr.hbm [resolvable:$true] %s974_s29 }
  0x13   : > { %v898_v0 = vld [vmem:[%s1252_s1 + $0x8] sm:$0xff]  ;;  %v897_v1 = vld [vmem:[%s1252_s1] sm:$0xff]  ;;  %s1266_s15 = smov (!%p274_p10, %s790_s15), 31  ;;  %vm357_vm0 = vcmask 261120   ;;  %v902_v9 = vld [vmem:[%s1254_s3 + $0x18] sm:$0xff]  ;;  %vm491_vm1 = vcmask 523264   ;;  %p981_p0 = scmp.lt.s32.totalorder %s975_s29, %s1258_s7 }
  0x14   : > { %388 = vmatpush.bf16.msra.mxu0 %v898_v0  ;;  %907 = vmatpush.bf16.msra.mxu3 %v898_v0  ;;  %s791_s18 = sshll.u32 %s1266_s15, 2  ;;  %v901_v11 = vld [vmem:[%s1254_s3 + $0x10] sm:$0xff]  ;;  %v900_v12 = vld [vmem:[%s1254_s3 + $0x8] sm:$0xff]  ;;  %v899_v13 = vld [vmem:[%s1254_s3] sm:$0xff]  ;;  %vm617_vm2 = vcmask 392192   ;;  %s976_s28 = scalar_lea.hbm %s975_s29, 128 }
  0x15   : > { %s277_s21 = scalar_lea.vmem %s1251_s0, %s791_s18  ;;  %520 = vmatpush.bf16.msra.mxu1 %v902_v9  ;;  %v1147_v15 = vld [vmem:[%s1253_s2] ss:$0 sm:$0xff]  ;;  %p977_p11 = scmp.ne.s32.totalorder %s975_s29, %s976_s28 }
  0x16   : > { %v889_v2 = vld [vmem:[%s277_s21] sm:$0xff]  ;;  %v890_v3 = vld [vmem:[%s277_s21 + $0x8] sm:$0xff]  ;;  %v891_v4 = vld [vmem:[%s277_s21 + $0x10] sm:$0xff]  ;;  %p982_p1 = scmp.lt.s32.totalorder %s980_s14, %s976_s28 }
  0x17   : > { %v892_v5 = vld [vmem:[%s277_s21 + $0x18] sm:$0xff]  ;;  %v893_v6 = vld [vmem:[%s277_s21 + $0x20] sm:$0xff]  ;;  %v894_v8 = vld [vmem:[%s277_s21 + $0x28] sm:$0xff]  ;;  %p978_p12 = pnand %p977_p11, %p1104_p5 }
  0x18   : > { %389 = vmatpush.bf16.msra.mxu0 %v897_v1  ;;  %908 = vmatpush.bf16.msra.mxu3 %v897_v1  ;;  %v896_v7 = vld [vmem:[%s277_s21 + $0x38] sm:$0xff]  ;;  %v895_v10 = vld [vmem:[%s277_s21 + $0x30] sm:$0xff]  ;;  %s720_s21 = sshll.u32 %s1199_s16, 4  ;;  %p983_p2 = por %p982_p1, %p981_p0  ;;  %s721_s21 = int_to_ptr.vmem [resolvable:$true] %s720_s21 }
  0x19   : > { %521 = vmatpush.bf16.msra.mxu1 %v901_v11  ;;  %v905_v1 = vld [vmem:[%s1256_s5 + $0x10] sm:$0xff]  ;;  %p979_p13 = pneg %p978_p12 }
  0x1a   : > { %647 = vmatpush.bf16.msra.mxu2 %v905_v1 }
  0x1b   : > { %832 = vmatmul.msk.bf16.vlgmr.msra.gmra.mxu0 %vm357_vm0, %v889_v2  ;;  %839 = vmatmul.msk.bf16.vlgmr.msra.gmra.mxu3 %vm357_vm0, %v896_v7  ;;  %p984_p3 = pnand %p983_p2, %p979_p13 }
  0x1c   : > { %909 = vmatpush.bf16.msrb.mxu3 %v902_v9 }
  0x1d   : > { %522 = vmatpush.bf16.msra.mxu1 %v900_v12 }
  0x20   : > { %910 = vmatpush.bf16.msrb.mxu3 %v901_v11  ;;  %v958_v11 = vld [vmem:[%s1255_s4] ss:$0 sm:$0xff] }
  0x21   : > { %523 = vmatpush.bf16.msra.mxu1 %v899_v13 }
  0x24   : > { %911 = vmatpush.bf16.msrb.mxu3 %v900_v12 }
  0x28   : > { %912 = vmatpush.bf16.msrb.mxu3 %v899_v13 }
  0x2b   : > { %833 = vmatmul.msk.bf16.gmra.mxu0 %vm357_vm0, %v890_v3  ;;  %v904_v3 = vld [vmem:[%s1256_s5 + $0x8] sm:$0xff] }
  0x2c   : > { %913 = vmatpush.bf16.msra.mxu3 %v905_v1  ;;  %648 = vmatpush.bf16.msra.mxu2 %v904_v3 }
  0x30   : > { %914 = vmatpush.bf16.msra.mxu3 %v904_v3  ;;  %v959_v3 = vld [vmem:[%s1257_s6] ss:$0 sm:$0xff] }
  0x3b   : > { %834 = vmatmul.msk.bf16.gmra.mxu0 %vm357_vm0, %v891_v4 }
  0x4b   : > { %835 = vmatmul.msk.bf16.gmra.mxu0 %vm357_vm0, %v892_v5 }
  0x5b   : > { %836 = vmatmul.msk.bf16.gmra.mxu0 %vm357_vm0, %v893_v6  ;;  %v903_v6 = vld [vmem:[%s1256_s5] sm:$0xff] }
  0x5c   : > { %649 = vmatpush.bf16.msra.mxu2 %v903_v6  ;;  %915 = vmatpush.bf16.msra.mxu3 %v903_v6 }
  0x6b   : > { %837 = vmatmul.msk.bf16.gmra.mxu0 %vm357_vm0, %v894_v8 }
  0x7b   : > { %838 = vmatmul.msk.bf16.gmra.mxu0 %vm357_vm0, %v895_v10 }
  0x98   : > { %v391_v14 = vpop.f32.mrf.mxu0 }
  0x99   : > { %v392_v16 = vadd.f32 %v1147_v15, %v391_v14 }
  0x9b   : > { %v431_v19 = vmax.f32 %v392_v16, 0.0 }
  0x9e   : > { %v426_v60 = vpop.f32.mrf.mxu3 }
  0x9f   : > { %v427_v4 = vadd.f32 %v1147_v15, %v426_v60 }
  0xa0   : > { %v393_v17 = vpop.f32.mrf.mxu0 }
  0xa1   : > { %v394_v18 = vadd.f32 %v1147_v15, %v393_v17  ;;  %v445_v7 = vmax.f32 %v427_v4, 0.0 }
  0xa3   : > { %v432_v20 = vmax.f32 %v394_v18, 0.0 }
  0xa5   : > { %v447_v21 = vpack.c.bf16 %v432_v20, %v431_v19 }
  0xa6   : > { %v428_v2 = vpop.f32.mrf.mxu3 }
  0xa7   : > { %856 = vmatmul.msk.bf16.vlgmr.msra.gmra.mxu1 %vm491_vm1, %v447_v21  ;;  %v429_v5 = vadd.f32 %v1147_v15, %v428_v2 }
  0xa8   : > { %v396_v22 = vpop.f32.mrf.mxu0 }
  0xa9   : > { %v397_v23 = vadd.f32 %v1147_v15, %v396_v22  ;;  %v446_v8 = vmax.f32 %v429_v5, 0.0 }
  0xab   : > { %v433_v26 = vmax.f32 %v397_v23, 0.0  ;;  %v454_v9 = vpack.c.bf16 %v446_v8, %v445_v7 }
  0xb0   : > { %v398_v24 = vpop.f32.mrf.mxu0 }
  0xb1   : > { %v399_v25 = vadd.f32 %v1147_v15, %v398_v24 }
  0xb3   : > { %v434_v27 = vmax.f32 %v399_v25, 0.0 }
  0xb5   : > { %v448_v28 = vpack.c.bf16 %v434_v27, %v433_v26 }
  0xb7   : > { %857 = vmatmul.msk.bf16.gmra.mxu1 %vm491_vm1, %v448_v28 }
  0xb8   : > { %v401_v29 = vpop.f32.mrf.mxu0 }
  0xb9   : > { %v402_v30 = vadd.f32 %v1147_v15, %v401_v29 }
  0xbb   : > { %v435_v33 = vmax.f32 %v402_v30, 0.0 }
  0xc0   : > { %v403_v31 = vpop.f32.mrf.mxu0 }
  0xc1   : > { %v404_v32 = vadd.f32 %v1147_v15, %v403_v31 }
  0xc3   : > { %v436_v34 = vmax.f32 %v404_v32, 0.0 }
  0xc5   : > { %v449_v35 = vpack.c.bf16 %v436_v34, %v435_v33 }
  0xc7   : > { %858 = vmatmul.msk.bf16.gmra.mxu1 %vm491_vm1, %v449_v35 }
  0xc8   : > { %v406_v36 = vpop.f32.mrf.mxu0 }
  0xc9   : > { %v407_v37 = vadd.f32 %v1147_v15, %v406_v36 }
  0xcb   : > { %v437_v40 = vmax.f32 %v407_v37, 0.0 }
  0xd0   : > { %v408_v38 = vpop.f32.mrf.mxu0 }
  0xd1   : > { %v409_v39 = vadd.f32 %v1147_v15, %v408_v38 }
  0xd3   : > { %v438_v41 = vmax.f32 %v409_v39, 0.0 }
  0xd5   : > { %v450_v42 = vpack.c.bf16 %v438_v41, %v437_v40 }
  0xd7   : > { %859 = vmatmul.msk.bf16.gmra.mxu1 %vm491_vm1, %v450_v42 }
  0xd8   : > { %v411_v43 = vpop.f32.mrf.mxu0 }
  0xd9   : > { %v412_v44 = vadd.f32 %v1147_v15, %v411_v43 }
  0xdb   : > { %v439_v47 = vmax.f32 %v412_v44, 0.0 }
  0xe0   : > { %v413_v45 = vpop.f32.mrf.mxu0 }
  0xe1   : > { %v414_v46 = vadd.f32 %v1147_v15, %v413_v45 }
  0xe3   : > { %v440_v48 = vmax.f32 %v414_v46, 0.0 }
  0xe5   : > { %v451_v49 = vpack.c.bf16 %v440_v48, %v439_v47 }
  0xe7   : > { %860 = vmatmul.msk.bf16.gmra.mxu1 %vm491_vm1, %v451_v49 }
  0xe8   : > { %v416_v50 = vpop.f32.mrf.mxu0 }
  0xe9   : > { %v417_v51 = vadd.f32 %v1147_v15, %v416_v50 }
  0xeb   : > { %v441_v54 = vmax.f32 %v417_v51, 0.0 }
  0xf0   : > { %v418_v52 = vpop.f32.mrf.mxu0 }
  0xf1   : > { %v419_v53 = vadd.f32 %v1147_v15, %v418_v52 }
  0xf3   : > { %v442_v55 = vmax.f32 %v419_v53, 0.0 }
  0xf5   : > { %v452_v56 = vpack.c.bf16 %v442_v55, %v441_v54 }
  0xf7   : > { %861 = vmatmul.msk.bf16.gmra.mxu1 %vm491_vm1, %v452_v56 }
  0xf8   : > { %v421_v57 = vpop.f32.mrf.mxu0 }
  0xf9   : > { %v422_v58 = vadd.f32 %v1147_v15, %v421_v57 }
  0xfb   : > { %v443_v62 = vmax.f32 %v422_v58, 0.0 }
 0x100   : > { %v423_v59 = vpop.f32.mrf.mxu0 }
 0x101   : > { %v424_v61 = vadd.f32 %v1147_v15, %v423_v59 }
 0x103   : > { %v444_v63 = vmax.f32 %v424_v61, 0.0 }
 0x105   : > { %v453_v0 = vpack.c.bf16 %v444_v63, %v443_v62 }
 0x107   : > { %862 = vmatmul.msk.bf16.vlgmr.msrb.gmra.mxu3 %vm491_vm1, %v453_v0 }
 0x117   : > { %863 = vmatmul.msk.bf16.gmra.mxu3 %vm491_vm1, %v454_v9 }
 0x124   : > { %v525_v10 = vpop.f32.mrf.mxu1 }
 0x125   : > { %v526_v12 = vadd.f32 %v958_v11, %v525_v10 }
 0x127   : > { %v565_v15 = vmax.f32 %v526_v12, 0.0 }
 0x12c   : > { %v527_v13 = vpop.f32.mrf.mxu1 }
 0x12d   : > { %v528_v14 = vadd.f32 %v958_v11, %v527_v13 }
 0x12f   : > { %v566_v16 = vmax.f32 %v528_v14, 0.0 }
 0x131   : > { %v581_v17 = vpack.c.bf16 %v566_v16, %v565_v15 }
 0x133   : > { %876 = vmatmul.msk.bf16.vlgmr.msra.gmra.mxu2 %vm617_vm2, %v581_v17 }
 0x134   : > { %v530_v18 = vpop.f32.mrf.mxu1 }
 0x135   : > { %v531_v19 = vadd.f32 %v958_v11, %v530_v18 }
 0x137   : > { %v567_v22 = vmax.f32 %v531_v19, 0.0 }
 0x13c   : > { %v532_v20 = vpop.f32.mrf.mxu1 }
 0x13d   : > { %v533_v21 = vadd.f32 %v958_v11, %v532_v20 }
 0x13f   : > { %v568_v23 = vmax.f32 %v533_v21, 0.0 }
 0x141   : > { %v582_v24 = vpack.c.bf16 %v568_v23, %v567_v22 }
 0x143   : > { %877 = vmatmul.msk.bf16.gmra.mxu2 %vm617_vm2, %v582_v24 }
 0x144   : > { %v535_v25 = vpop.f32.mrf.mxu1 }
 0x145   : > { %v536_v26 = vadd.f32 %v958_v11, %v535_v25 }
 0x147   : > { %v569_v29 = vmax.f32 %v536_v26, 0.0 }
 0x14c   : > { %v537_v27 = vpop.f32.mrf.mxu1 }
 0x14d   : > { %v538_v28 = vadd.f32 %v958_v11, %v537_v27 }
 0x14f   : > { %v570_v30 = vmax.f32 %v538_v28, 0.0 }
 0x151   : > { %v583_v31 = vpack.c.bf16 %v570_v30, %v569_v29 }
 0x153   : > { %878 = vmatmul.msk.bf16.gmra.mxu2 %vm617_vm2, %v583_v31 }
 0x154   : > { %v540_v32 = vpop.f32.mrf.mxu1 }
 0x155   : > { %v541_v33 = vadd.f32 %v958_v11, %v540_v32 }
 0x157   : > { %v571_v36 = vmax.f32 %v541_v33, 0.0 }
 0x15c   : > { %v542_v34 = vpop.f32.mrf.mxu1 }
 0x15d   : > { %v543_v35 = vadd.f32 %v958_v11, %v542_v34 }
 0x15f   : > { %v572_v37 = vmax.f32 %v543_v35, 0.0 }
 0x161   : > { %v584_v38 = vpack.c.bf16 %v572_v37, %v571_v36 }
 0x163   : > { %879 = vmatmul.msk.bf16.gmra.mxu2 %vm617_vm2, %v584_v38 }
 0x164   : > { %v545_v39 = vpop.f32.mrf.mxu1 }
 0x165   : > { %v546_v40 = vadd.f32 %v958_v11, %v545_v39 }
 0x167   : > { %v573_v43 = vmax.f32 %v546_v40, 0.0 }
 0x16c   : > { %v547_v41 = vpop.f32.mrf.mxu1 }
 0x16d   : > { %v548_v42 = vadd.f32 %v958_v11, %v547_v41 }
 0x16f   : > { %v574_v44 = vmax.f32 %v548_v42, 0.0 }
 0x171   : > { %v585_v45 = vpack.c.bf16 %v574_v44, %v573_v43 }
 0x173   : > { %880 = vmatmul.msk.bf16.gmra.mxu2 %vm617_vm2, %v585_v45 }
 0x174   : > { %v550_v46 = vpop.f32.mrf.mxu1 }
 0x175   : > { %v551_v47 = vadd.f32 %v958_v11, %v550_v46 }
 0x177   : > { %v575_v50 = vmax.f32 %v551_v47, 0.0 }
 0x17c   : > { %v552_v48 = vpop.f32.mrf.mxu1 }
 0x17d   : > { %v553_v49 = vadd.f32 %v958_v11, %v552_v48 }
 0x17f   : > { %v576_v51 = vmax.f32 %v553_v49, 0.0 }
 0x181   : > { %v586_v52 = vpack.c.bf16 %v576_v51, %v575_v50 }
 0x183   : > { %881 = vmatmul.msk.bf16.gmra.mxu2 %vm617_vm2, %v586_v52 }
 0x18a   : > { %v555_v53 = vpop.f32.mrf.mxu3 }
 0x18b   : > { %v556_v54 = vadd.f32 %v958_v11, %v555_v53 }
 0x18d   : > { %v577_v57 = vmax.f32 %v556_v54, 0.0 }
 0x192   : > { %v557_v55 = vpop.f32.mrf.mxu3 }
 0x193   : > { %v558_v56 = vadd.f32 %v958_v11, %v557_v55 }
 0x195   : > { %v578_v58 = vmax.f32 %v558_v56, 0.0 }
 0x197   : > { %v587_v59 = vpack.c.bf16 %v578_v58, %v577_v57 }
 0x199   : > { %882 = vmatmul.msk.bf16.vlgmr.msra.gmra.mxu3 %vm617_vm2, %v587_v59 }
 0x19a   : > { %v560_v60 = vpop.f32.mrf.mxu3 }
 0x19b   : > { %v561_v61 = vadd.f32 %v958_v11, %v560_v60 }
 0x19d   : > { %v579_v0 = vmax.f32 %v561_v61, 0.0 }
 0x1a2   : > { %v562_v62 = vpop.f32.mrf.mxu3 }
 0x1a3   : > { %v563_v63 = vadd.f32 %v958_v11, %v562_v62 }
 0x1a5   : > { %v580_v1 = vmax.f32 %v563_v63, 0.0 }
 0x1a7   : > { %v588_v2 = vpack.c.bf16 %v580_v1, %v579_v0 }
 0x1a9   : > { %883 = vmatmul.msk.bf16.gmra.mxu3 %vm617_vm2, %v588_v2 }
 0x1b6   : > { %v651_v4 = vpop.f32.mrf.mxu2 }
 0x1b7   : > { %v652_v5 = vadd.f32 %v959_v3, %v651_v4 }
 0x1b9   : > { %691 = vst [vmem:[%s1199_s16] sm:$0xff] %v652_v5 }
 0x1be   : > { %v653_v6 = vpop.f32.mrf.mxu2 }
 0x1bf   : > { %v654_v7 = vadd.f32 %v959_v3, %v653_v6 }
 0x1c1   : > { %692 = vst [vmem:[%s1199_s16 + $0x8] sm:$0xff] %v654_v7 }
 0x1c6   : > { %v656_v8 = vpop.f32.mrf.mxu2 }
 0x1c7   : > { %v657_v9 = vadd.f32 %v959_v3, %v656_v8 }
 0x1c9   : > { %693 = vst [vmem:[%s1199_s16 + $0x10] sm:$0xff] %v657_v9 }
 0x1ce   : > { %v658_v10 = vpop.f32.mrf.mxu2 }
 0x1cf   : > { %v659_v11 = vadd.f32 %v959_v3, %v658_v10 }
 0x1d1   : > { %694 = vst [vmem:[%s1199_s16 + $0x18] sm:$0xff] %v659_v11 }
 0x1d6   : > { %v661_v12 = vpop.f32.mrf.mxu2 }
 0x1d7   : > { %v662_v13 = vadd.f32 %v959_v3, %v661_v12 }
 0x1d9   : > { %695 = vst [vmem:[%s1199_s16 + $0x20] sm:$0xff] %v662_v13 }
 0x1de   : > { %v663_v14 = vpop.f32.mrf.mxu2 }
 0x1df   : > { %v664_v15 = vadd.f32 %v959_v3, %v663_v14 }
 0x1e1   : > { %696 = vst [vmem:[%s1199_s16 + $0x28] sm:$0xff] %v664_v15 }
 0x1e6   : > { %v666_v16 = vpop.f32.mrf.mxu2 }
 0x1e7   : > { %v667_v17 = vadd.f32 %v959_v3, %v666_v16 }
 0x1e9   : > { %697 = vst [vmem:[%s1199_s16 + $0x30] sm:$0xff] %v667_v17 }
 0x1ee   : > { %v668_v18 = vpop.f32.mrf.mxu2 }
 0x1ef   : > { %v669_v19 = vadd.f32 %v959_v3, %v668_v18 }
 0x1f1   : > { %698 = vst [vmem:[%s1199_s16 + $0x38] sm:$0xff] %v669_v19 }
 0x1f6   : > { %v671_v20 = vpop.f32.mrf.mxu2 }
 0x1f7   : > { %v672_v21 = vadd.f32 %v959_v3, %v671_v20 }
 0x1f9   : > { %699 = vst [vmem:[%s1199_s16 + $0x40] sm:$0xff] %v672_v21 }
 0x1fe   : > { %v673_v22 = vpop.f32.mrf.mxu2 }
 0x1ff   : > { %v674_v23 = vadd.f32 %v959_v3, %v673_v22 }
 0x201   : > { %700 = vst [vmem:[%s1199_s16 + $0x48] sm:$0xff] %v674_v23 }
 0x206   : > { %v676_v24 = vpop.f32.mrf.mxu2 }
 0x207   : > { %v677_v25 = vadd.f32 %v959_v3, %v676_v24 }
 0x209   : > { %701 = vst [vmem:[%s1199_s16 + $0x50] sm:$0xff] %v677_v25 }
 0x20e   : > { %v678_v26 = vpop.f32.mrf.mxu2 }
 0x20f   : > { %v679_v27 = vadd.f32 %v959_v3, %v678_v26 }
 0x211   : > { %702 = vst [vmem:[%s1199_s16 + $0x58] sm:$0xff] %v679_v27 }
 0x21c   : > { %v681_v28 = vpop.f32.mrf.mxu3 }
 0x21d   : > { %v682_v29 = vadd.f32 %v959_v3, %v681_v28 }
 0x21f   : > { %703 = vst [vmem:[%s1199_s16 + $0x60] sm:$0xff] %v682_v29 }
 0x224   : > { %v683_v30 = vpop.f32.mrf.mxu3 }
 0x225   : > { %v684_v31 = vadd.f32 %v959_v3, %v683_v30 }
 0x227   : > { %704 = vst [vmem:[%s1199_s16 + $0x68] sm:$0xff] %v684_v31 }
 0x22c   : > { %v686_v32 = vpop.f32.mrf.mxu3 }
 0x22d   : > { %v687_v33 = vadd.f32 %v959_v3, %v686_v32 }
 0x22f   : > { %705 = vst [vmem:[%s1199_s16 + $0x70] sm:$0xff] %v687_v33 }
 0x234   : > { %v688_v34 = vpop.f32.mrf.mxu3 }
 0x235   : > { %v689_v35 = vadd.f32 %v959_v3, %v688_v34 }
 0x237   : > { %706 = vst [vmem:[%s1199_s16 + $0x78] sm:$0xff] %v689_v35 }
 0x238   : > { %987 = shalt.err (!%p984_p3)
}
 0x239   : > { %s1024_s9 = smov 128   ;;  %s1025_s16 = smov 8  }
 0x23a   : > { %916 = dma.vmem_to_hbm [thread:$0]  (%p1104_p5), %s721_s21, 2048, %s723_s22, %s708_s23, %s1024_s9, %s1024_s9, %s1025_s16  }
 0x23b PF: > { %p922_p4 = scmp.ge.s32.totalorder %s1022_s27, 2  ;;  %s737_s18 = sand.u32 1, %s1010_s24  }
 0x23c   : > { %s738_s19 = scalar_lea.sflag [#allocation3], %s737_s18 }
 0x23d   : > { %p919_p7 = pnand %p922_p4, %p1108_p6 }
 0x23f   : > { %p920_p8 = pneg %p919_p7 }
 0x241   : > { %1005 = dma.done.wait (%p920_p8), %s738_s19, 2048  }
 0x242   : > { %1007 = vsyncadd (%p920_p8), %s738_s19, 4294965248  ;;  %p17_p9 = scmp.ge.s32.totalorder %s1091_s30, 4   ;;  %s1261_s24 = smov %s1014_s25 }
 0x243   : > { %s1262_s25 = smov %s1018_s26  ;;  %s1263_s26 = smov %s1102_s10 }
 0x244   : > { %s1264_s27 = smov %s1091_s30  ;;  %19 = sbr.rel (!%p17_p9) target bundleno = 3 (0x3), region = 83 }
 0x249   :  { %744 = vsyncpa [#allocation3], 1 }
 0x24a   :  { %746 = vsyncpa [#allocation3 + $0x1], 1 }

</bundles_post_ra>
